<compile_context>
chip_gen: v5e
topology: v5e:2x2
jax: 0.10.0
libtpu: 0.0.40
codegen_flags: <defaults>
</compile_context>

<pallas_src>
import jax
import jax.numpy as jnp
from jax.experimental import pallas as pl
from jax.experimental.pallas import tpu as pltpu

# Fixed hyper-parameters of the representative inner model.
CONV_KH = 3
CONV_KW = 3
CONV_PAD = 1
TB_MAX = 32      # samples per grid step: TB*OC = 256 fills the v6e/v7x MXU rows
                 # (two clean 128-row passes on v5e); capped so grid >= 2 when N >= 2.


def _round_up(v, m):
    return -(-v // m) * m


# ---------------------------------------------------------------------------
# Fused Pallas kernel.  One grid step == one block of TB samples.
#   Conv2d + bias + ReLU : (TB*OC, TB*K) @ (TB*K, HW)   -> (TB*OC, HW)
#   Flatten(NCHW)+Linear : (TB*OC, HW)   @ (HW, OC*F)   -> (TB*OC, OC*F)
#   block-diag extract   : gsel @ (q*mask) @ rsel + fcb -> (TB, F_pad)
# Everything between the patch DMA and the final store lives in vregs/VMEM.
# ---------------------------------------------------------------------------
def _fused_block_kernel(patches_ref, wconv_ref, bconv_ref, fcw_ref,
                        mask_ref, gsel_ref, rsel_ref, fcb_ref, o_ref):
    # patches_ref: (1, TB*K, HW)   per-block im2col patches (sample-major rows)
    # wconv_ref  : (TB*OC, TB*K)   block-diagonal conv weight (resident)
    # bconv_ref  : (TB*OC, 1)      conv bias tiled per sample
    # fcw_ref    : (HW, OC*F)      FC weight, NCHW-flatten permutation folded in
    # mask_ref   : (TB*OC, OC*F)   block-diag channel mask (0/1)
    # gsel_ref   : (TB, TB*OC)     per-sample row-group sum selector (0/1)
    # rsel_ref   : (OC*F, F_pad)   column fold selector (0/1), lane-padded
    # fcb_ref    : (1, F_pad)      FC bias, lane-padded
    # o_ref      : (1, TB, F_pad)

    # Conv2d + bias + ReLU as one matmul; act row t*OC+c == sample t, channel c.
    act = jnp.dot(wconv_ref[...], patches_ref[0],
                  preferred_element_type=jnp.float32)             # (TB*OC, HW)
    act = jnp.maximum(act + bconv_ref[...], 0.0)

    # Flatten (NCHW) + Linear: one full-size MXU matmul ...
    q = jnp.dot(act, fcw_ref[...],
                preferred_element_type=jnp.float32)               # (TB*OC, OC*F)
    # ... then the block-diagonal extraction out[t, f] = sum_c q[t*OC+c, c*F+f]
    # as a mask-multiply plus two tiny selector matmuls (no serialized slice
    # chain; runs on MXU/VPU slack).
    z = jnp.dot(gsel_ref[...], q * mask_ref[...],
                preferred_element_type=jnp.float32)               # (TB, OC*F)
    out = jnp.dot(z, rsel_ref[...],
                  preferred_element_type=jnp.float32) + fcb_ref[...]   # (TB, F_pad)
    o_ref[0] = out.astype(o_ref.dtype)


# ---------------------------------------------------------------------------
# Host-side glue (runs under jit; a few cheap XLA ops on the raw input).
# ---------------------------------------------------------------------------
def _im2col(x, kh=CONV_KH, kw=CONV_KW, pad=CONV_PAD):
    """NCHW x -> (N, K_pad, H*W) patches, feature index k = (ki*kw + kj)*C + c,
    K zero-padded only to the next multiple of 8 (sublane alignment)."""
    n, c, h, w = x.shape
    k = kh * kw * c
    kpad = _round_up(k, 8)
    xp = jnp.pad(x, ((0, 0), (0, 0), (pad, pad), (pad, pad)))
    views = [xp[:, :, i:i + h, j:j + w].reshape(n, c, h * w)
             for i in range(kh) for j in range(kw)]
    patches = jnp.concatenate(views, axis=1)                   # (N, K, H*W)
    return jnp.pad(patches, ((0, 0), (0, kpad - k), (0, 0)))   # (N, K_pad, H*W)


def init_raw_params(key, in_c=4, out_c=8, hw=16, kh=3, kw=3, fc_out=32,
                    dtype=jnp.float32):
    """PyTorch-layout parameters: conv (OIHW), Linear (out, in)."""
    k1, k2, k3, k4 = jax.random.split(key, 4)
    conv_w = jax.random.normal(k1, (out_c, in_c, kh, kw), dtype) * 0.1
    conv_b = jax.random.normal(k2, (out_c,), dtype) * 0.1
    fc_in = out_c * hw * hw
    fc_w = jax.random.normal(k3, (fc_out, fc_in), dtype) * 0.02
    fc_b = jax.random.normal(k4, (fc_out,), dtype) * 0.02
    return {"conv_w": conv_w, "conv_b": conv_b, "fc_w": fc_w, "fc_b": fc_b}


def pick_block_batch(n):
    """Samples per grid step: fill the MXU (TB*OC up to 256) but keep >= 2 grid
    steps when n >= 2 so both v7x TensorCores get work."""
    return max(1, min(TB_MAX, (n + 1) // 2))


def prepare_params(raw, *, tb):
    """One-time hoisting of all weight-side layout work for block batch `tb`."""
    conv_w, conv_b = raw["conv_w"], raw["conv_b"]        # (OC,C,KH,KW), (OC,)
    fc_w, fc_b = raw["fc_w"], raw["fc_b"]                # (F, OC*H*W),  (F,)
    oc, cin, kh, kw = conv_w.shape
    k = cin * kh * kw
    kpad = _round_up(k, 8)
    fdim = fc_w.shape[0]
    fpad = _round_up(fdim, 128)
    hw = fc_w.shape[1] // oc
    eye = lambda m: jnp.eye(m, dtype=jnp.float32)

    # Conv weight -> (OC, K_pad), feature order (ki*kw + kj)*C + c (== _im2col),
    # then block-diagonal over the TB samples of one grid step.
    convw = jnp.pad(conv_w.transpose(0, 2, 3, 1).reshape(oc, k),
                    ((0, 0), (0, kpad - k)))
    wconv = jnp.kron(eye(tb), convw)                          # (TB*OC, TB*Kp)
    bconv = jnp.tile(conv_b.reshape(oc, 1), (tb, 1))          # (TB*OC, 1)

    # FC weight -> lane-dense (HW, OC*F) with the NCHW Flatten folded in:
    #   fcw[s, c*F + f] == fc_w[f, c*HW + s].
    fcw = fc_w.reshape(fdim, oc, hw).transpose(2, 1, 0).reshape(hw, oc * fdim)

    # Selector operands for the block-diagonal extraction.
    mask = jnp.tile(jnp.kron(eye(oc), jnp.ones((1, fdim), jnp.float32)),
                    (tb, 1))                                  # (TB*OC, OC*F)
    gsel = jnp.kron(eye(tb), jnp.ones((1, oc), jnp.float32))  # (TB, TB*OC)
    rsel = jnp.pad(jnp.tile(eye(fdim), (oc, 1)),
                   ((0, 0), (0, fpad - fdim)))                # (OC*F, F_pad)
    fcb = jnp.pad(fc_b.reshape(1, fdim), ((0, 0), (0, fpad - fdim)))  # (1, F_pad)

    return {"wconv": wconv, "bconv": bconv, "fcw": fcw,
            "mask": mask, "gsel": gsel, "rsel": rsel, "fcb": fcb}


def preprocess_model_forward(kparams, x):
    """PreProcessModel.forward(x) == self.model(x):
    Conv2d(3x3, pad=1) -> ReLU -> Flatten -> Linear, one fused Pallas kernel."""
    n, _, h, w = x.shape
    hw = h * w
    tb = kparams["gsel"].shape[0]
    oc = kparams["gsel"].shape[1] // tb
    kpad = kparams["wconv"].shape[1] // tb
    fdim = kparams["fcw"].shape[1] // oc
    fpad = kparams["rsel"].shape[1]
    assert kparams["fcw"].shape[0] == hw

    patches = _im2col(x)                                     # (N, Kp, HW)
    nb = (n + tb - 1) // tb
    npad = nb * tb
    if npad != n:
        patches = jnp.pad(patches, ((0, npad - n), (0, 0), (0, 0)))
    patches = patches.reshape(nb, tb * kpad, hw)             # sample-major rows

    # Useful work only (no pad zeros, no block-diagonal FC waste).
    flops = 2 * n * oc * hw * (kpad + fdim)
    bytes_accessed = 4 * (n * kpad * hw + kparams["wconv"].size
                          + kparams["fcw"].size + kparams["mask"].size
                          + n * fdim)

    out = pl.pallas_call(
        _fused_block_kernel,
        out_shape=jax.ShapeDtypeStruct((nb, tb, fpad), jnp.float32),
        grid=(nb,),
        in_specs=[
            pl.BlockSpec((1, tb * kpad, hw), lambda i: (i, 0, 0)),  # per-block patches
            pl.BlockSpec(kparams["wconv"].shape, lambda i: (0, 0)),  # weights resident
            pl.BlockSpec(kparams["bconv"].shape, lambda i: (0, 0)),
            pl.BlockSpec(kparams["fcw"].shape, lambda i: (0, 0)),
            pl.BlockSpec(kparams["mask"].shape, lambda i: (0, 0)),
            pl.BlockSpec(kparams["gsel"].shape, lambda i: (0, 0)),
            pl.BlockSpec(kparams["rsel"].shape, lambda i: (0, 0)),
            pl.BlockSpec(kparams["fcb"].shape, lambda i: (0, 0)),
        ],
        out_specs=pl.BlockSpec((1, tb, fpad), lambda i: (i, 0, 0)),  # lane-dense store
        compiler_params=pltpu.CompilerParams(
            dimension_semantics=("parallel",)),              # batch blocks -> both TCs
        cost_estimate=pl.CostEstimate(flops=flops, transcendentals=0,
                                      bytes_accessed=bytes_accessed),
    )(patches, kparams["wconv"], kparams["bconv"], kparams["fcw"],
      kparams["mask"], kparams["gsel"], kparams["rsel"], kparams["fcb"])
    return out.reshape(npad, fpad)[:n, :fdim]


# ---------------------------------------------------------------------------
# Pure-JAX reference (PyTorch semantics) for the correctness check.
# ---------------------------------------------------------------------------
def _reference_forward(raw, x):
    n, _, h, w = x.shape
    oc = raw["conv_w"].shape[0]
    y = jax.lax.conv_general_dilated(
        x, raw["conv_w"], window_strides=(1, 1), padding=((1, 1), (1, 1)),
        dimension_numbers=("NCHW", "OIHW", "NCHW"))
    y = jnp.maximum(y + raw["conv_b"][None, :, None, None], 0.0)
    flat = y.reshape(n, oc * h * w)                      # PyTorch NCHW Flatten
    return flat @ raw["fc_w"].T + raw["fc_b"]


if __name__ == "__main__":
    key = jax.random.PRNGKey(0)
    k_param, k_x = jax.random.split(key)

    raw = init_raw_params(k_param)                       # PyTorch-layout weights
    x = jax.random.normal(k_x, (2, 4, 16, 16), jnp.float32)   # NCHW, like PyTorch

    tb = pick_block_batch(x.shape[0])
    kparams = prepare_params(raw, tb=tb)                 # one-time layout hoisting

    fwd = jax.jit(preprocess_model_forward)
    out = jax.block_until_ready(fwd(kparams, x))

    assert out.shape == (2, 32), out.shape
    assert out.dtype == jnp.float32

    ref = _reference_forward(raw, x)
    max_err = float(jnp.max(jnp.abs(out - ref)))
    assert jnp.allclose(out, ref, atol=1e-4, rtol=1e-4), max_err

    print("KERNEL_OK")
</pallas_src>

<mosaic_0001>
module attributes {stable_mosaic.version = 11 : i64} {
  func.func @_fused_block_kernel(%arg0: i32, %arg1: memref<1x40x256xf32, #tpu.memory_space<vmem>>, %arg2: memref<8x40xf32, #tpu.memory_space<vmem>>, %arg3: memref<8x1xf32, #tpu.memory_space<vmem>>, %arg4: memref<256x256xf32, #tpu.memory_space<vmem>>, %arg5: memref<8x256xf32, #tpu.memory_space<vmem>>, %arg6: memref<1x8xf32, #tpu.memory_space<vmem>>, %arg7: memref<256x128xf32, #tpu.memory_space<vmem>>, %arg8: memref<1x128xf32, #tpu.memory_space<vmem>>, %arg9: memref<1x1x128xf32, #tpu.memory_space<vmem>>) attributes {dimension_semantics = [#tpu.dimension_semantics<parallel>], iteration_bounds = array<i64: 2>, scalar_prefetch = 0 : i64, scratch_operands = 0 : i64, tpu.core_type = #tpu.core_type<tc>, window_params = [{transform_indices = @transform_0, window_bounds = array<i64: 1, 40, 256>}, {pipeline_mode = #tpu.pipeline_mode<synchronous>, transform_indices = @transform_1, window_bounds = array<i64: 8, 40>}, {pipeline_mode = #tpu.pipeline_mode<synchronous>, transform_indices = @transform_2, window_bounds = array<i64: 8, 1>}, {pipeline_mode = #tpu.pipeline_mode<synchronous>, transform_indices = @transform_3, window_bounds = array<i64: 256, 256>}, {pipeline_mode = #tpu.pipeline_mode<synchronous>, transform_indices = @transform_4, window_bounds = array<i64: 8, 256>}, {pipeline_mode = #tpu.pipeline_mode<synchronous>, transform_indices = @transform_5, window_bounds = array<i64: 1, 8>}, {pipeline_mode = #tpu.pipeline_mode<synchronous>, transform_indices = @transform_6, window_bounds = array<i64: 256, 128>}, {pipeline_mode = #tpu.pipeline_mode<synchronous>, transform_indices = @transform_7, window_bounds = array<i64: 1, 128>}, {transform_indices = @transform_8, window_bounds = array<i64: 1, 1, 128>}]} {
    %c0 = arith.constant 0 : index
    %c0_0 = arith.constant 0 : index
    %0 = vector.load %arg2[%c0, %c0_0] : memref<8x40xf32, #tpu.memory_space<vmem>>, vector<8x40xf32>
    %c0_1 = arith.constant 0 : index
    %c0_2 = arith.constant 0 : index
    %c0_3 = arith.constant 0 : index
    %1 = vector.load %arg1[%c0_1, %c0_2, %c0_3] : memref<1x40x256xf32, #tpu.memory_space<vmem>>, vector<1x40x256xf32>
    %2 = vector.shape_cast %1 : vector<1x40x256xf32> to vector<40x256xf32>
    %cst = arith.constant dense<0.000000e+00> : vector<8x256xf32>
    %3 = tpu.matmul %0, %2, %cst {dimension_numbers = #tpu.dot_dimension_numbers<[1], [0], [0], [1], [0, 0, 1, 1], [], []>} : vector<8x40xf32>, vector<40x256xf32>, vector<8x256xf32> -> vector<8x256xf32>
    %c0_4 = arith.constant 0 : index
    %c0_5 = arith.constant 0 : index
    %4 = vector.load %arg3[%c0_4, %c0_5] : memref<8x1xf32, #tpu.memory_space<vmem>>, vector<8x1xf32>
    %5 = vector.broadcast %4 : vector<8x1xf32> to vector<8x256xf32>
    %6 = arith.addf %3, %5 : vector<8x256xf32>
    %cst_6 = arith.constant 0.000000e+00 : f32
    %7 = vector.broadcast %cst_6 : f32 to vector<8x256xf32>
    %8 = arith.maximumf %6, %7 : vector<8x256xf32>
    %c0_7 = arith.constant 0 : index
    %c0_8 = arith.constant 0 : index
    %9 = vector.load %arg4[%c0_7, %c0_8] : memref<256x256xf32, #tpu.memory_space<vmem>>, vector<256x256xf32>
    %cst_9 = arith.constant dense<0.000000e+00> : vector<8x256xf32>
    %10 = tpu.matmul %8, %9, %cst_9 {dimension_numbers = #tpu.dot_dimension_numbers<[1], [0], [0], [1], [0, 0, 1, 1], [], []>} : vector<8x256xf32>, vector<256x256xf32>, vector<8x256xf32> -> vector<8x256xf32>
    %c0_10 = arith.constant 0 : index
    %c0_11 = arith.constant 0 : index
    %11 = vector.load %arg6[%c0_10, %c0_11] : memref<1x8xf32, #tpu.memory_space<vmem>>, vector<1x8xf32>
    %c0_12 = arith.constant 0 : index
    %c0_13 = arith.constant 0 : index
    %12 = vector.load %arg5[%c0_12, %c0_13] : memref<8x256xf32, #tpu.memory_space<vmem>>, vector<8x256xf32>
    %13 = arith.mulf %10, %12 : vector<8x256xf32>
    %cst_14 = arith.constant dense<0.000000e+00> : vector<1x256xf32>
    %14 = tpu.matmul %11, %13, %cst_14 {dimension_numbers = #tpu.dot_dimension_numbers<[1], [0], [0], [1], [0, 0, 1, 1], [], []>} : vector<1x8xf32>, vector<8x256xf32>, vector<1x256xf32> -> vector<1x256xf32>
    %c0_15 = arith.constant 0 : index
    %c0_16 = arith.constant 0 : index
    %15 = vector.load %arg7[%c0_15, %c0_16] : memref<256x128xf32, #tpu.memory_space<vmem>>, vector<256x128xf32>
    %cst_17 = arith.constant dense<0.000000e+00> : vector<1x128xf32>
    %16 = tpu.matmul %14, %15, %cst_17 {dimension_numbers = #tpu.dot_dimension_numbers<[1], [0], [0], [1], [0, 0, 1, 1], [], []>} : vector<1x256xf32>, vector<256x128xf32>, vector<1x128xf32> -> vector<1x128xf32>
    %c0_18 = arith.constant 0 : index
    %c0_19 = arith.constant 0 : index
    %17 = vector.load %arg8[%c0_18, %c0_19] : memref<1x128xf32, #tpu.memory_space<vmem>>, vector<1x128xf32>
    %18 = arith.addf %16, %17 : vector<1x128xf32>
    %c0_20 = arith.constant 0 : index
    %c0_21 = arith.constant 0 : index
    %c0_22 = arith.constant 0 : index
    %19 = vector.load %arg9[%c0_20, %c0_21, %c0_22] : memref<1x1x128xf32, #tpu.memory_space<vmem>>, vector<1x1x128xf32>
    %20 = vector.shape_cast %19 : vector<1x1x128xf32> to vector<1x128xf32>
    %21 = vector.shape_cast %18 : vector<1x128xf32> to vector<1x1x128xf32>
    tpu.vector_store %arg9[%c0_20, %c0_21, %c0_22], %21 {strides = array<i32>} : memref<1x1x128xf32, #tpu.memory_space<vmem>>, vector<1x1x128xf32>,
    return
  }
  func.func @transform_0(%arg0: i32) -> (i32, i32, i32) {
    %c0_i32 = arith.constant 0 : i32
    %c0_i32_0 = arith.constant 0 : i32
    %c0_i32_1 = arith.constant 0 : i32
    return %arg0, %c0_i32, %c0_i32_0 : i32, i32, i32
  }
  func.func @transform_1(%arg0: i32) -> (i32, i32) {
    %c0_i32 = arith.constant 0 : i32
    %c0_i32_0 = arith.constant 0 : i32
    %c0_i32_1 = arith.constant 0 : i32
    return %c0_i32, %c0_i32_0 : i32, i32
  }
  func.func @transform_2(%arg0: i32) -> (i32, i32) {
    %c0_i32 = arith.constant 0 : i32
    %c0_i32_0 = arith.constant 0 : i32
    %c0_i32_1 = arith.constant 0 : i32
    return %c0_i32, %c0_i32_0 : i32, i32
  }
  func.func @transform_3(%arg0: i32) -> (i32, i32) {
    %c0_i32 = arith.constant 0 : i32
    %c0_i32_0 = arith.constant 0 : i32
    %c0_i32_1 = arith.constant 0 : i32
    return %c0_i32, %c0_i32_0 : i32, i32
  }
  func.func @transform_4(%arg0: i32) -> (i32, i32) {
    %c0_i32 = arith.constant 0 : i32
    %c0_i32_0 = arith.constant 0 : i32
    %c0_i32_1 = arith.constant 0 : i32
    return %c0_i32, %c0_i32_0 : i32, i32
  }
  func.func @transform_5(%arg0: i32) -> (i32, i32) {
    %c0_i32 = arith.constant 0 : i32
    %c0_i32_0 = arith.constant 0 : i32
    %c0_i32_1 = arith.constant 0 : i32
    return %c0_i32, %c0_i32_0 : i32, i32
  }
  func.func @transform_6(%arg0: i32) -> (i32, i32) {
    %c0_i32 = arith.constant 0 : i32
    %c0_i32_0 = arith.constant 0 : i32
    %c0_i32_1 = arith.constant 0 : i32
    return %c0_i32, %c0_i32_0 : i32, i32
  }
  func.func @transform_7(%arg0: i32) -> (i32, i32) {
    %c0_i32 = arith.constant 0 : i32
    %c0_i32_0 = arith.constant 0 : i32
    %c0_i32_1 = arith.constant 0 : i32
    return %c0_i32, %c0_i32_0 : i32, i32
  }
  func.func @transform_8(%arg0: i32) -> (i32, i32, i32) {
    %c0_i32 = arith.constant 0 : i32
    %c0_i32_0 = arith.constant 0 : i32
    %c0_i32_1 = arith.constant 0 : i32
    return %arg0, %c0_i32, %c0_i32_0 : i32, i32, i32
  }
}

</mosaic_0001>

<bundles_post_ra>
// kernel: preprocess_model_forward.1
= control target key start
LH: loop header
LB: loop body
LE: loop exit
PB: predicated region body
PF: predicated region fallthrough
CT: control target
= control target key end

     0   :  { %13 = vsyncpa [#allocation3], 0  ;;  %s1255_s0 = inlined_call_operand.vmem [shape: f32[2,40,256], index: 0, kind: input, shape index: {}]   ;;  %s1256_s1 = inlined_call_operand.vmem [shape: f32[8,40], index: 1, kind: input, shape index: {}]   ;;  %s1257_s2 = inlined_call_operand.vmem [shape: f32[8,1], index: 2, kind: input, shape index: {}]   ;;  %s1258_s3 = inlined_call_operand.vmem [shape: f32[256,256], index: 3, kind: input, shape index: {}]   ;;  %s1259_s4 = inlined_call_operand.vmem [shape: f32[8,256], index: 4, kind: input, shape index: {}]   ;;  %s1260_s5 = inlined_call_operand.vmem [shape: f32[1,8], index: 5, kind: input, shape index: {}]   ;;  %s1261_s6 = inlined_call_operand.vmem [shape: f32[256,128], index: 6, kind: input, shape index: {}]   ;;  %s1262_s7 = inlined_call_operand.vmem [shape: f32[1,128], index: 7, kind: input, shape index: {}]   ;;  %s1263_s8 = inlined_call_operand.hbm [shape: f32[2,1,128], index: 8, kind: output, shape index: {}]  }
   0x1   :  { %15 = vsyncpa [#allocation3 + $0x1], 0  ;;  %s864_s27 = smov 0   ;;  %s866_s28 = smov 0  }
   0x2   :  { %s868_s29 = smov 0   ;;  %s870_s30 = smov 0  }
   0x3 LB: > { %s885_s9 = sadd.s32 4294967295, %s816_s30   ;;  %s701_s10 = sadd.s32 4294967294, %s816_s30   ;;  %s816_s30 = sphi %s870_s30, %s1269_s30   ;;  %s812_s29 = sphi %s868_s29, %s1268_s29   ;;  %s808_s28 = sphi %s866_s28, %s1267_s28   ;;  %s804_s27 = sphi %s864_s27, %s1266_s27  }
   0x4   : > { %s889_s11 = sadd.s32 1, %s816_s30   ;;  %s201_s12 = sadd.s32 1, %s812_s29 }
   0x5   : > { %s198_s13 = ssub.s32 %s816_s30, %s889_s11  ;;  %p211_p0 = scmp.ne.s32.totalorder %s812_s29, %s808_s28 }
   0x6   : > { %p199_p1 = scmp.eq.s32.totalorder %s198_s13, 0  ;;  %p212_p2 = scmp.eq.s32.totalorder %s885_s9, 1 }
   0x7   : > { %p217_p3 = scmp.ne.s32.totalorder %s808_s28, %s804_s27  ;;  %p218_p4 = scmp.eq.s32.totalorder %s701_s10, 1 }
   0x8   : > { %s900_s14 = scalar_select %p199_p1, %s812_s29, %s201_s12  }
   0x9   : > { %p902_p5 = por %p212_p2, %p211_p0  ;;  %p906_p6 = por %p218_p4, %p217_p3 }
   0xa   : > { %p704_p7 = scmp.ge.s32.totalorder %s816_s30, 1  ;;  %p265_p8 = scmp.lt.s32.totalorder %s816_s30, 3 }
   0xc   : > { %p266_p9 = pnand %p704_p7, %p265_p8 }
   0xd   : > { %p298_p10 = scmp.lt.s32.totalorder (!%p266_p9), %s885_s9, 1  ;;  %s296_s17 = sand.u32 (!%p266_p9), 1, %s808_s28  }
   0xe   : > { %269 = sbr.rel (%p266_p9) target bundleno = 567 (0x237), region = 52  ;;  %s642_s20 = scalar_lea.hbm (!%p266_p9), %s1263_s8, %s885_s9 }
   0xf   : > { %s297_s22 = scalar_lea.vmem (!%p266_p9), [#allocation2], %s296_s17  ;;  %s646_s26 = sshll.u32 (!%p266_p9), %s642_s20, 4  ;;  %s647_s26 = int_to_ptr.hbm [resolvable:$true] %s646_s26 }
  0x10   : > { %s644_s24 = sshll.u32 (!%p266_p9), %s297_s22, 4  ;;  %s634_s10 = scalar_lea.sflag (!%p266_p9), [#allocation3], %s296_s17  ;;  %s645_s24 = int_to_ptr.vmem [resolvable:$true] %s644_s24 }
  0x11   : > { %s768_s12 = sshra.s32 (!%p266_p9), %s647_s26, 4  ;;  %s774_s18 = scalar_lea.hbm (!%p266_p9), %s1263_s8, 2  ;;  %s769_s12 = int_to_ptr.hbm [resolvable:$true] %s768_s12 }
  0x12   : > { %s770_s13 = scalar_lea.hbm (!%p266_p9), %s769_s12, 1  ;;  %p775_p0 = scmp.lt.s32.totalorder (!%p266_p9), %s769_s12, %s1263_s8 }
  0x13   : > { %v314_v0 = vld [vmem:[%s1257_s2] sm:$0xff]  ;;  %v396_v1 = vld [vmem:[%s1258_s3 + $0xf0] sm:$0xff]  ;;  %v818_v2 = vmov 0   ;;  %s299_s23 = scalar_select %p298_p10, %s885_s9, 1  ;;  %vm320_vm0 = vcmask 326656   ;;  %v397_v28 = vld [vmem:[%s1258_s3 + $0xf8] sm:$0xff] }
  0x14   : > { %753 = vset.pattern.permute.xlu0 %v818_v2  ;;  %430 = vmatpush.msra.mxu2 %v396_v1  ;;  %v428_v3 = vld [vmem:[%s1258_s3 + $0x1f0] sm:$0xff]  ;;  %v394_v4 = vld [vmem:[%s1258_s3 + $0xe0] sm:$0xff]  ;;  %v429_v29 = vld [vmem:[%s1258_s3 + $0x1f8] sm:$0xff]  ;;  %vm515_vm1 = vcmask 64512   ;;  %p771_p11 = scmp.ne.s32.totalorder %s769_s12, %s770_s13  ;;  %p776_p1 = scmp.lt.s32.totalorder %s774_s18, %s770_s13 }
  0x15   : > { %317 = vperm.xlu0 %753, %v314_v0   ;;  %450 = vmatpush.msra.mxu3 %v428_v3  ;;  %v426_v5 = vld [vmem:[%s1258_s3 + $0x1e0] sm:$0xff]  ;;  %v392_v6 = vld [vmem:[%s1258_s3 + $0xd0] sm:$0xff]  ;;  %s712_s19 = smul.u32 80, %s299_s23  ;;  %v395_v32 = vld [vmem:[%s1258_s3 + $0xe8] sm:$0xff] }
  0x16   : > { %431 = vmatpush.msra.mxu2 %v394_v4  ;;  %v424_v7 = vld [vmem:[%s1258_s3 + $0x1d0] sm:$0xff]  ;;  %v390_v8 = vld [vmem:[%s1258_s3 + $0xc0] sm:$0xff]  ;;  %v427_v33 = vld [vmem:[%s1258_s3 + $0x1e8] sm:$0xff]  ;;  %p772_p12 = pnand %p771_p11, %p902_p5  ;;  %p777_p2 = por %p776_p1, %p775_p0 }
  0x17   : > { %451 = vmatpush.msra.mxu3 %v426_v5  ;;  %s302_s25 = scalar_lea.vmem %s1255_s0, %s712_s19  ;;  %v422_v9 = vld [vmem:[%s1258_s3 + $0x1c0] sm:$0xff]  ;;  %v388_v10 = vld [vmem:[%s1258_s3 + $0xb0] sm:$0xff]  ;;  %v393_v36 = vld [vmem:[%s1258_s3 + $0xd8] sm:$0xff] }
  0x18   : > { %432 = vmatpush.msra.mxu2 %v392_v6  ;;  %v312_v11 = vld [vmem:[%s302_s25 + $0x40] sm:$0xff]  ;;  %v313_v12 = vld [vmem:[%s302_s25 + $0x48] sm:$0xff]  ;;  %v310_v13 = vld [vmem:[%s302_s25 + $0x30] sm:$0xff]  ;;  %p773_p13 = pneg %p772_p12 }
  0x19   : > { %452 = vmatpush.msra.mxu3 %v424_v7  ;;  %335 = vmatpush.msra.mxu0 %v312_v11  ;;  %v311_v14 = vld [vmem:[%s302_s25 + $0x38] sm:$0xff]  ;;  %v420_v15 = vld [vmem:[%s1258_s3 + $0x1b0] sm:$0xff]  ;;  %v308_v16 = vld [vmem:[%s302_s25 + $0x20] sm:$0xff] }
  0x1a   : > { %433 = vmatpush.msra.mxu2 %v390_v8  ;;  %355 = vmatpush.msra.mxu1 %v313_v12  ;;  %v309_v17 = vld [vmem:[%s302_s25 + $0x28] sm:$0xff]  ;;  %v386_v18 = vld [vmem:[%s1258_s3 + $0xa0] sm:$0xff]  ;;  %v306_v19 = vld [vmem:[%s302_s25 + $0x10] sm:$0xff]  ;;  %p778_p3 = pnand %p777_p2, %p773_p13 }
  0x1b   : > { %453 = vmatpush.msra.mxu3 %v422_v9  ;;  %336 = vmatpush.msra.mxu0 %v310_v13  ;;  %v307_v20 = vld [vmem:[%s302_s25 + $0x18] sm:$0xff]  ;;  %v418_v21 = vld [vmem:[%s1258_s3 + $0x1a0] sm:$0xff]  ;;  %v384_v22 = vld [vmem:[%s1258_s3 + $0x90] sm:$0xff] }
  0x1c   : > { %434 = vmatpush.msra.mxu2 %v388_v10  ;;  %356 = vmatpush.msra.mxu1 %v311_v14  ;;  %v416_v23 = vld [vmem:[%s1258_s3 + $0x190] sm:$0xff]  ;;  %v304_v24 = vld [vmem:[%s302_s25] sm:$0xff]  ;;  %v305_v25 = vld [vmem:[%s302_s25 + $0x8] sm:$0xff] }
  0x1d   : > { %454 = vmatpush.msra.mxu3 %v420_v15  ;;  %337 = vmatpush.msra.mxu0 %v308_v16  ;;  %v382_v26 = vld [vmem:[%s1258_s3 + $0x80] sm:$0xff]  ;;  %v380_v31 = vld [vmem:[%s1258_s3 + $0x70] sm:$0xff]  ;;  %v425_v37 = vld [vmem:[%s1258_s3 + $0x1d8] sm:$0xff] }
  0x1e   : > { %435 = vmatpush.msra.mxu2 %v386_v18  ;;  %357 = vmatpush.msra.mxu1 %v309_v17  ;;  %v303_v27 = vld [vmem:[%s1256_s1] sm:$0xff]  ;;  %v412_v34 = vld [vmem:[%s1258_s3 + $0x170] sm:$0xff]  ;;  %v391_v40 = vld [vmem:[%s1258_s3 + $0xc8] sm:$0xff] }
  0x1f   : > { %455 = vmatpush.msra.mxu3 %v418_v21  ;;  %338 = vmatpush.msra.mxu0 %v306_v19  ;;  %v414_v30 = vld [vmem:[%s1258_s3 + $0x180] sm:$0xff]  ;;  %v376_v39 = vld [vmem:[%s1258_s3 + $0x50] sm:$0xff]  ;;  %v423_v41 = vld [vmem:[%s1258_s3 + $0x1c8] sm:$0xff] }
  0x20   : > { %436 = vmatpush.msra.mxu2 %v384_v22  ;;  %358 = vmatpush.msra.mxu1 %v307_v20  ;;  %v378_v35 = vld [vmem:[%s1258_s3 + $0x60] sm:$0xff]  ;;  %v408_v42 = vld [vmem:[%s1258_s3 + $0x150] sm:$0xff]  ;;  %v389_v44 = vld [vmem:[%s1258_s3 + $0xb8] sm:$0xff] }
  0x21   : > { %456 = vmatpush.msra.mxu3 %v416_v23  ;;  %339 = vmatpush.msra.mxu0 %v304_v24  ;;  %v410_v38 = vld [vmem:[%s1258_s3 + $0x160] sm:$0xff]  ;;  %v421_v45 = vld [vmem:[%s1258_s3 + $0x1b8] sm:$0xff]  ;;  %v372_v47 = vld [vmem:[%s1258_s3 + $0x30] sm:$0xff] }
  0x22   : > { %437 = vmatpush.msra.mxu2 %v382_v26  ;;  %359 = vmatpush.msra.mxu1 %v305_v25  ;;  %v374_v43 = vld [vmem:[%s1258_s3 + $0x40] sm:$0xff]  ;;  %v387_v48 = vld [vmem:[%s1258_s3 + $0xa8] sm:$0xff]  ;;  %v404_v50 = vld [vmem:[%s1258_s3 + $0x130] sm:$0xff] }
  0x23   : > { %706 = vmatmul.msk.f32.vlgmr.msra.gmra.mxu0 %vm320_vm0, %v303_v27  ;;  %707 = vmatmul.msk.f32.vlgmr.msra.gmra.mxu1 %vm320_vm0, %v303_v27  ;;  %v406_v46 = vld [vmem:[%s1258_s3 + $0x140] sm:$0xff]  ;;  %v419_v49 = vld [vmem:[%s1258_s3 + $0x1a8] sm:$0xff]  ;;  %v385_v52 = vld [vmem:[%s1258_s3 + $0x98] sm:$0xff] }
  0x24   : > { %470 = vmatpush.msrb.mxu0 %v397_v28  ;;  %490 = vmatpush.msrb.mxu1 %v429_v29  ;;  %v370_v51 = vld [vmem:[%s1258_s3 + $0x20] sm:$0xff]  ;;  %v417_v53 = vld [vmem:[%s1258_s3 + $0x198] sm:$0xff]  ;;  %v383_v55 = vld [vmem:[%s1258_s3 + $0x88] sm:$0xff] }
  0x25   : > { %457 = vmatpush.msra.mxu3 %v414_v30  ;;  %438 = vmatpush.msra.mxu2 %v380_v31  ;;  %v402_v54 = vld [vmem:[%s1258_s3 + $0x120] sm:$0xff]  ;;  %v415_v56 = vld [vmem:[%s1258_s3 + $0x188] sm:$0xff]  ;;  %v381_v57 = vld [vmem:[%s1258_s3 + $0x78] sm:$0xff] }
  0x26   : > { %471 = vmatpush.msrb.mxu0 %v395_v32  ;;  %491 = vmatpush.msrb.mxu1 %v427_v33  ;;  %v413_v58 = vld [vmem:[%s1258_s3 + $0x178] sm:$0xff]  ;;  %v379_v59 = vld [vmem:[%s1258_s3 + $0x68] sm:$0xff]  ;;  %v368_v5 = vld [vmem:[%s1258_s3 + $0x10] sm:$0xff] }
  0x27   : > { %458 = vmatpush.msra.mxu3 %v412_v34  ;;  %439 = vmatpush.msra.mxu2 %v378_v35  ;;  %v411_v60 = vld [vmem:[%s1258_s3 + $0x168] sm:$0xff]  ;;  %v377_v61 = vld [vmem:[%s1258_s3 + $0x58] sm:$0xff]  ;;  %v400_v6 = vld [vmem:[%s1258_s3 + $0x110] sm:$0xff] }
  0x28   : > { %472 = vmatpush.msrb.mxu0 %v393_v36  ;;  %492 = vmatpush.msrb.mxu1 %v425_v37  ;;  %v409_v62 = vld [vmem:[%s1258_s3 + $0x158] sm:$0xff]  ;;  %v375_v63 = vld [vmem:[%s1258_s3 + $0x48] sm:$0xff]  ;;  %v366_v9 = vld [vmem:[%s1258_s3] sm:$0xff] }
  0x29   : > { %459 = vmatpush.msra.mxu3 %v410_v38  ;;  %440 = vmatpush.msra.mxu2 %v376_v39  ;;  %v407_v0 = vld [vmem:[%s1258_s3 + $0x148] sm:$0xff]  ;;  %v373_v1 = vld [vmem:[%s1258_s3 + $0x38] sm:$0xff]  ;;  %v398_v10 = vld [vmem:[%s1258_s3 + $0x100] sm:$0xff] }
  0x2a   : > { %473 = vmatpush.msrb.mxu0 %v391_v40  ;;  %493 = vmatpush.msrb.mxu1 %v423_v41  ;;  %v405_v2 = vld [vmem:[%s1258_s3 + $0x138] sm:$0xff]  ;;  %v371_v3 = vld [vmem:[%s1258_s3 + $0x28] sm:$0xff]  ;;  %v573_v21 = vld [vmem:[%s1261_s6 + $0x70] sm:$0xff] }
  0x2b   : > { %460 = vmatpush.msra.mxu3 %v408_v42  ;;  %441 = vmatpush.msra.mxu2 %v374_v43  ;;  %v403_v4 = vld [vmem:[%s1258_s3 + $0x128] sm:$0xff]  ;;  %v369_v7 = vld [vmem:[%s1258_s3 + $0x18] sm:$0xff]  ;;  %v589_v23 = vld [vmem:[%s1261_s6 + $0xf0] sm:$0xff] }
  0x2c   : > { %474 = vmatpush.msrb.mxu0 %v389_v44  ;;  %494 = vmatpush.msrb.mxu1 %v421_v45  ;;  %v401_v8 = vld [vmem:[%s1258_s3 + $0x118] sm:$0xff]  ;;  %v367_v11 = vld [vmem:[%s1258_s3 + $0x8] sm:$0xff]  ;;  %v571_v26 = vld [vmem:[%s1261_s6 + $0x60] sm:$0xff] }
  0x2d   : > { %461 = vmatpush.msra.mxu3 %v406_v46  ;;  %442 = vmatpush.msra.mxu2 %v372_v47  ;;  %v399_v12 = vld [vmem:[%s1258_s3 + $0x108] sm:$0xff]  ;;  %v574_v20 = vld [vmem:[%s1261_s6 + $0x78] sm:$0xff]  ;;  %v587_v27 = vld [vmem:[%s1261_s6 + $0xe0] sm:$0xff] }
  0x2e   : > { %475 = vmatpush.msrb.mxu0 %v387_v48  ;;  %495 = vmatpush.msrb.mxu1 %v419_v49  ;;  %v590_v22 = vld [vmem:[%s1261_s6 + $0xf8] sm:$0xff]  ;;  %v572_v24 = vld [vmem:[%s1261_s6 + $0x68] sm:$0xff]  ;;  %v569_v30 = vld [vmem:[%s1261_s6 + $0x50] sm:$0xff] }
  0x2f   : > { %462 = vmatpush.msra.mxu3 %v404_v50  ;;  %443 = vmatpush.msra.mxu2 %v370_v51  ;;  %v588_v25 = vld [vmem:[%s1261_s6 + $0xe8] sm:$0xff]  ;;  %v570_v28 = vld [vmem:[%s1261_s6 + $0x58] sm:$0xff]  ;;  %v585_v31 = vld [vmem:[%s1261_s6 + $0xd0] sm:$0xff] }
  0x30   : > { %476 = vmatpush.msrb.mxu0 %v385_v52  ;;  %496 = vmatpush.msrb.mxu1 %v417_v53  ;;  %v586_v29 = vld [vmem:[%s1261_s6 + $0xd8] sm:$0xff]  ;;  %v568_v32 = vld [vmem:[%s1261_s6 + $0x48] sm:$0xff]  ;;  %v567_v34 = vld [vmem:[%s1261_s6 + $0x40] sm:$0xff] }
  0x31   : > { %463 = vmatpush.msra.mxu3 %v402_v54  ;;  %444 = vmatpush.msra.mxu2 %v368_v5  ;;  %v584_v33 = vld [vmem:[%s1261_s6 + $0xc8] sm:$0xff]  ;;  %v583_v35 = vld [vmem:[%s1261_s6 + $0xc0] sm:$0xff]  ;;  %v566_v36 = vld [vmem:[%s1261_s6 + $0x38] sm:$0xff] }
  0x32   : > { %477 = vmatpush.msrb.mxu0 %v383_v55  ;;  %497 = vmatpush.msrb.mxu1 %v415_v56  ;;  %v582_v37 = vld [vmem:[%s1261_s6 + $0xb8] sm:$0xff]  ;;  %v565_v38 = vld [vmem:[%s1261_s6 + $0x30] sm:$0xff]  ;;  %v564_v40 = vld [vmem:[%s1261_s6 + $0x28] sm:$0xff] }
  0x33   : > { %464 = vmatpush.msra.mxu3 %v400_v6  ;;  %445 = vmatpush.msra.mxu2 %v366_v9  ;;  %v581_v39 = vld [vmem:[%s1261_s6 + $0xb0] sm:$0xff]  ;;  %v580_v41 = vld [vmem:[%s1261_s6 + $0xa8] sm:$0xff]  ;;  %v563_v42 = vld [vmem:[%s1261_s6 + $0x20] sm:$0xff] }
  0x34   : > { %478 = vmatpush.msrb.mxu0 %v381_v57  ;;  %498 = vmatpush.msrb.mxu1 %v413_v58  ;;  %v579_v43 = vld [vmem:[%s1261_s6 + $0xa0] sm:$0xff]  ;;  %v512_v46 = vld [vmem:[%s1259_s4 + $0x8] sm:$0xff]  ;;  %v562_v48 = vld [vmem:[%s1261_s6 + $0x18] sm:$0xff] }
  0x35   : > { %465 = vmatpush.msra.mxu3 %v398_v10  ;;  %592 = vmatpush.msrb.mxu2 %v574_v20  ;;  %v578_v49 = vld [vmem:[%s1261_s6 + $0x98] sm:$0xff]  ;;  %v561_v51 = vld [vmem:[%s1261_s6 + $0x10] sm:$0xff]  ;;  %v511_v55 = vld [vmem:[%s1259_s4] sm:$0xff] }
  0x36   : > { %479 = vmatpush.msrb.mxu0 %v379_v59  ;;  %499 = vmatpush.msrb.mxu1 %v411_v60  ;;  %v577_v52 = vld [vmem:[%s1261_s6 + $0x90] sm:$0xff]  ;;  %v510_v56 = vld [vmem:[%s1260_s5] sm:$0x1]  ;;  %v560_v57 = vld [vmem:[%s1261_s6 + $0x8] sm:$0xff] }
  0x37   : > { %612 = vmatpush.msrb.mxu3 %v590_v22  ;;  %593 = vmatpush.msrb.mxu2 %v573_v21  ;;  %v559_v60 = vld [vmem:[%s1261_s6] sm:$0xff] }
  0x38   : > { %480 = vmatpush.msrb.mxu0 %v377_v61  ;;  %500 = vmatpush.msrb.mxu1 %v409_v62  ;;  %v576_v61 = vld [vmem:[%s1261_s6 + $0x88] sm:$0xff]  ;;  %v575_v62 = vld [vmem:[%s1261_s6 + $0x80] sm:$0xff] }
  0x39   : > { %613 = vmatpush.msrb.mxu3 %v589_v23  ;;  %594 = vmatpush.msrb.mxu2 %v572_v24 }
  0x3a   : > { %481 = vmatpush.msrb.mxu0 %v375_v63  ;;  %501 = vmatpush.msrb.mxu1 %v407_v0 }
  0x3b   : > { %614 = vmatpush.msrb.mxu3 %v588_v25  ;;  %595 = vmatpush.msrb.mxu2 %v571_v26 }
  0x3c   : > { %482 = vmatpush.msrb.mxu0 %v373_v1  ;;  %502 = vmatpush.msrb.mxu1 %v405_v2  ;;  %v591_v1 = vld [vmem:[%s1262_s7] sm:$0x1] }
  0x3d   : > { %615 = vmatpush.msrb.mxu3 %v587_v27  ;;  %596 = vmatpush.msrb.mxu2 %v570_v28 }
  0x3e   : > { %483 = vmatpush.msrb.mxu0 %v371_v3  ;;  %503 = vmatpush.msrb.mxu1 %v403_v4 }
  0x3f   : > { %616 = vmatpush.msrb.mxu3 %v586_v29  ;;  %597 = vmatpush.msrb.mxu2 %v569_v30 }
  0x40   : > { %484 = vmatpush.msrb.mxu0 %v369_v7  ;;  %504 = vmatpush.msrb.mxu1 %v401_v8 }
  0x41   : > { %617 = vmatpush.msrb.mxu3 %v585_v31  ;;  %598 = vmatpush.msrb.mxu2 %v568_v32 }
  0x42   : > { %485 = vmatpush.msrb.mxu0 %v367_v11  ;;  %505 = vmatpush.msrb.mxu1 %v399_v12 }
  0x43   : > { %618 = vmatpush.msrb.mxu3 %v584_v33  ;;  %599 = vmatpush.msrb.mxu2 %v567_v34 }
  0x45   : > { %619 = vmatpush.msrb.mxu3 %v583_v35  ;;  %600 = vmatpush.msrb.mxu2 %v566_v36 }
  0x47   : > { %620 = vmatpush.msrb.mxu3 %v582_v37  ;;  %601 = vmatpush.msrb.mxu2 %v565_v38 }
  0x49   : > { %621 = vmatpush.msrb.mxu3 %v581_v39  ;;  %602 = vmatpush.msrb.mxu2 %v564_v40 }
  0x4b   : > { %622 = vmatpush.msrb.mxu3 %v580_v41  ;;  %603 = vmatpush.msrb.mxu2 %v563_v42 }
  0x4d   : > { %623 = vmatpush.msrb.mxu3 %v579_v43  ;;  %604 = vmatpush.msrb.mxu2 %v562_v48 }
  0x4f   : > { %624 = vmatpush.msrb.mxu3 %v578_v49  ;;  %605 = vmatpush.msrb.mxu2 %v561_v51 }
  0x51   : > { %625 = vmatpush.msrb.mxu3 %v577_v52  ;;  %606 = vmatpush.msrb.mxu2 %v560_v57 }
  0x53   : > { %607 = vmatpush.msrb.mxu2 %v559_v60  ;;  %626 = vmatpush.msrb.mxu3 %v576_v61 }
  0x55   : > { %627 = vmatpush.msrb.mxu3 %v575_v62 }
  0x87   : > { %v318_v13 = vpop.permute.xlu0 %317 }
  0xa0   : > { %v341_v14 = vpop.f32.mrf.mxu0  ;;  %v361_v15 = vpop.f32.mrf.mxu1 }
  0xa1   : > { %v342_v16 = vadd.f32 %v341_v14, %v318_v13  ;;  %v362_v17 = vadd.f32 %v361_v15, %v318_v13 }
  0xa3   : > { %v364_v18 = vmax.f32 %v342_v16, 0.0  ;;  %v365_v19 = vmax.f32 %v362_v17, 0.0 }
  0xa5   : > { %446 = vmatmul.f32.vlgmr.msra.gmra.mxu2 %v364_v18  ;;  %466 = vmatmul.f32.vlgmr.msra.gmra.mxu3 %v365_v19 }
  0xa6   : > { %486 = vmatmul.f32.vlgmr.msrb.gmra.mxu0 %v364_v18  ;;  %506 = vmatmul.f32.vlgmr.msrb.gmra.mxu1 %v365_v19 }
 0x123   : > { %v487_v44 = vpop.f32.mrf.mxu0  ;;  %v507_v45 = vpop.f32.mrf.mxu1 }
 0x124   : > { %v508_v47 = vadd.f32 %v507_v45, %v487_v44 }
 0x126   : > { %v514_v50 = vmul.f32 %v512_v46, %v508_v47 }
 0x128   : > { %554 = vmatpush.msra.mxu1 %v514_v50  ;;  %v447_v53 = vpop.f32.mrf.mxu2  ;;  %v467_v54 = vpop.f32.mrf.mxu3 }
 0x129   : > { %v468_v58 = vadd.f32 %v467_v54, %v447_v53  ;;  %709 = vmatmul.msk.f32.vlgmr.msra.gmra.mxu1 %vm515_vm1, %v510_v56 }
 0x12b   : > { %v513_v59 = vmul.f32 %v511_v55, %v468_v58 }
 0x12d   : > { %534 = vmatpush.msra.mxu0 %v513_v59 }
 0x12e   : > { %708 = vmatmul.msk.f32.vlgmr.msra.gmra.mxu0 %vm515_vm1, %v510_v56 }
 0x1a6   : > { %v556_v63 = vpop.f32.mrf.mxu1 }
 0x1a7   : > { %628 = vmatmul.f32.vlgmr.msrb.gmra.mxu3 %v556_v63 }
 0x1ab   : > { %v536_v0 = vpop.f32.mrf.mxu0 }
 0x1ac   : > { %608 = vmatmul.f32.vlgmr.msrb.gmra.mxu2 %v536_v0 }
 0x22a   : > { %v629_v3 = vpop.f32.mrf.mxu3 }
 0x22f   : > { %v609_v2 = vpop.f32.mrf.mxu2 }
 0x230   : > { %v610_v4 = vadd.f32 %v609_v2, %v591_v1 }
 0x232   : > { %v630_v5 = vadd.f32 %v629_v3, %v610_v4 }
 0x234   : > { %632 = vst [vmem:[%s297_s22] sm:$0x1] %v630_v5 }
 0x235   : > { %781 = shalt.err (!%p778_p3)
}
 0x236   : > { %713 = dma.vmem_to_hbm [thread:$0]  (%p902_p5), %s645_s24, 16, %s647_s26, %s634_s10  }
 0x237 PF: > { %p719_p4 = scmp.ge.s32.totalorder %s816_s30, 2  ;;  %s658_s17 = sand.u32 1, %s804_s27  }
 0x238   : > { %s659_s20 = scalar_lea.sflag [#allocation3], %s658_s17 }
 0x239   : > { %p716_p7 = pnand %p719_p4, %p906_p6 }
 0x23b   : > { %p717_p8 = pneg %p716_p7 }
 0x23d   : > { %799 = dma.done.wait (%p717_p8), %s659_s20, 16  }
 0x23e   : > { %801 = vsyncadd (%p717_p8), %s659_s20, 4294967280  ;;  %p18_p9 = scmp.ge.s32.totalorder %s889_s11, 4   ;;  %s1266_s27 = smov %s808_s28 }
 0x23f   : > { %s1267_s28 = smov %s812_s29  ;;  %s1268_s29 = smov %s900_s14 }
 0x240   : > { %s1269_s30 = smov %s889_s11  ;;  %20 = sbr.rel (!%p18_p9) target bundleno = 3 (0x3), region = 87 }
 0x245   :  { %664 = vsyncpa [#allocation3], 1 }
 0x246   :  { %666 = vsyncpa [#allocation3 + $0x1], 1 }

</bundles_post_ra>
